<compile_context>
chip_gen: v6e
topology: v6e:2x2x1
jax: 0.10.0
libtpu: 0.0.40
codegen_flags: <defaults>
</compile_context>

<pallas_src>
import jax
import jax.numpy as jnp
from jax import lax
from jax.experimental import pallas as pl
from jax.experimental.pallas import tpu as pltpu


def _round_up(x, m):
    return ((x + m - 1) // m) * m


def _vmem_capacity_bytes():
    """Physical VMEM per TensorCore; conservative fallback if the query fails."""
    try:
        return int(pltpu.get_tpu_info().vmem_capacity_bytes)
    except Exception:
        return 64 * 1024 * 1024  # v7x per-TC VMEM (smallest of the fleet)


def _choose_tq(n, max_tq):
    """Largest divisor of N <= max_tq that is a multiple of 16 (pref.) or 8.

    Falls back to N (single full-row tile) only when N has no such divisor,
    e.g. tiny/odd spatial sizes, where the residency is small anyway.
    """
    cap = min(max_tq, n)
    for align in (16, 8):
        for t in range(cap, align - 1, -1):
            if n % t == 0 and t % align == 0:
                return t
    return n


def self_attn_kernel(q_ref, k_ref, v_ref, x_ref, gamma_ref, out_ref, attn_ref):
    # Per grid step (b, qi):
    #   q_ref    : (1, TQ, C8p)  bf16  query rows (lane-padded projection)
    #   k_ref    : (1, N,  C8p)  bf16  all keys   (resident across qi)
    #   v_ref    : (1, N,  C)    bf16  all values (resident across qi)
    #   x_ref    : (1, TQ, C)    f32   residual tile
    #   gamma_ref: (1,)          f32   SMEM scalar
    #   out_ref  : (1, TQ, C)    f32
    #   attn_ref : (1, TQ, N)    bf16 (or f32)
    #
    # energy[i, j] = <q_i, k_j>; contract last dims of both (no explicit k.T).
    # Padded lanes of q/k are exactly zero, so they do not change the result.
    energy = lax.dot_general(
        q_ref[0], k_ref[0],
        dimension_numbers=(((1,), (1,)), ((), ())),
        preferred_element_type=jnp.float32)                       # (TQ, N) f32

    # Row-wise numerically stable softmax in f32; denominator via the EUP
    # approximate reciprocal (rows sum to 1 within ~1e-3 relative).
    m = jnp.max(energy, axis=-1, keepdims=True)
    e = jnp.exp(energy - m)
    attn = e * pl.reciprocal(jnp.sum(e, axis=-1, keepdims=True), approx=True)

    attn_ref[0] = attn.astype(attn_ref.dtype)

    # out[i, c] = sum_j attn[i, j] * v[j, c]   (MXU in bf16, f32 accumulation)
    p = attn.astype(jnp.bfloat16)
    out_nc = jnp.dot(p, v_ref[0], preferred_element_type=jnp.float32)  # (TQ, C)

    # Residual add stays in f32.
    out_ref[0] = gamma_ref[0] * out_nc + x_ref[0]


def self_attn_forward(x_nchw, wq, bq, wk, bk, wv, bv, gamma, *,
                      max_tq=None, attn_dtype=jnp.bfloat16):
    """x_nchw: (B, C, W, H) f32.

    Returns (out (B, C, W, H) f32, attention (B, N, N) attn_dtype).
    attention defaults to bfloat16 to halve the dominant HBM writeback; pass
    attn_dtype=jnp.float32 for an exact-width attention matrix.
    """
    B, C, W, H = x_nchw.shape
    N = W * H
    C8 = wq.shape[0]
    C8p = _round_up(max(C8, 1), 128)     # lane-pad the tiny C//8 projection dim

    vmem_cap = _vmem_capacity_bytes()
    if max_tq is None:
        # Bigger tiles on 128 MiB parts (v5e/v6e), smaller on 64 MiB (v7x).
        max_tq = 512 if vmem_cap >= (96 << 20) else 256
    TQ = _choose_tq(N, max_tq)
    n_q = N // TQ

    # NCHW -> (B, N, C); pixel index n = w*H + h (same flattening as
    # x.view(B, C, W*H) in the PyTorch module).
    x_bnc = x_nchw.reshape(B, C, N).transpose(0, 2, 1)

    # 1x1-conv projections hoisted to XLA (f32 matmuls, then cast to bf16 for
    # the kernel).  Q/K are zero-padded to 128 lanes so QK^T is unchanged but
    # loads are lane-dense and the MXU contraction depth is a full 128.
    q = jnp.einsum('bnc,oc->bno', x_bnc, wq) + bq[None, None, :]   # (B, N, C8)
    k = jnp.einsum('bnc,oc->bno', x_bnc, wk) + bk[None, None, :]   # (B, N, C8)
    v = jnp.einsum('bnc,oc->bno', x_bnc, wv) + bv[None, None, :]   # (B, N, C)
    pad = C8p - C8
    q_bf = jnp.pad(q, ((0, 0), (0, 0), (0, pad))).astype(jnp.bfloat16)
    k_bf = jnp.pad(k, ((0, 0), (0, 0), (0, pad))).astype(jnp.bfloat16)
    v_bf = v.astype(jnp.bfloat16)
    gamma1 = gamma.reshape(1).astype(jnp.float32)

    attn_itemsize = 2 if attn_dtype == jnp.bfloat16 else 4

    # VMEM budget (double-buffered pipeline tiles + softmax temporaries).
    f32b, bf16b = 4, 2
    budget = (2 * N * C8p * bf16b            # resident K block (x2 buffers)
              + 2 * N * C * bf16b            # resident V block
              + 2 * TQ * C8p * bf16b         # Q tile
              + 2 * TQ * C * f32b            # x residual tile
              + 2 * TQ * C * f32b            # out tile
              + 2 * TQ * N * attn_itemsize   # attention out tile
              + 5 * TQ * N * f32b)           # energy / exp / attn temporaries
    # Never request the full physical VMEM (leave compiler headroom, esp. v7x).
    vmem_limit = int(min(max(int(1.5 * budget), 32 << 20), int(0.75 * vmem_cap)))

    flops = 2 * B * N * N * (C8p + C)        # QK^T + attn@V (projections are XLA)
    bytes_accessed = (B * N * C8p * 2 * 2    # q + k (bf16)
                      + B * N * C * 2        # v (bf16)
                      + 2 * B * N * C * 4    # x in + out (f32)
                      + B * N * N * attn_itemsize)
    cost = pl.CostEstimate(flops=flops, transcendentals=B * N * N,
                           bytes_accessed=bytes_accessed)

    out_bnc, attn = pl.pallas_call(
        self_attn_kernel,
        out_shape=(
            jax.ShapeDtypeStruct((B, N, C), jnp.float32),
            jax.ShapeDtypeStruct((B, N, N), attn_dtype),
        ),
        grid_spec=pltpu.PrefetchScalarGridSpec(
            num_scalar_prefetch=0,
            grid=(B, n_q),
            in_specs=[
                pl.BlockSpec((1, TQ, C8p), lambda b, q: (b, q, 0)),   # q tile
                pl.BlockSpec((1, N, C8p), lambda b, q: (b, 0, 0)),    # k (resident)
                pl.BlockSpec((1, N, C), lambda b, q: (b, 0, 0)),      # v (resident)
                pl.BlockSpec((1, TQ, C), lambda b, q: (b, q, 0)),     # x residual tile
                pl.BlockSpec(memory_space=pltpu.MemorySpace.SMEM),    # gamma scalar
            ],
            out_specs=[
                pl.BlockSpec((1, TQ, C), lambda b, q: (b, q, 0)),     # out (B,N,C)
                pl.BlockSpec((1, TQ, N), lambda b, q: (b, q, 0)),     # attention
            ],
        ),
        compiler_params=pltpu.CompilerParams(
            dimension_semantics=("parallel", "parallel"),
            vmem_limit_bytes=vmem_limit),
        cost_estimate=cost,
    )(q_bf, k_bf, v_bf, x_bnc, gamma1)

    # (B, N, C) -> NCHW (layout glue; O(N*C) traffic, small vs the N*N stream).
    out_nchw = out_bnc.transpose(0, 2, 1).reshape(B, C, W, H)
    return out_nchw, attn


def self_attn_reference(x_nchw, wq, bq, wk, bk, wv, bv, gamma):
    """Pure-JAX f32 reference mirroring the PyTorch forward."""
    B, C, W, H = x_nchw.shape
    N = W * H
    x_flat = x_nchw.reshape(B, C, N)                                   # (B, C, N)
    q = jnp.einsum('oc,bcn->bon', wq, x_flat) + bq[None, :, None]      # (B, C8, N)
    k = jnp.einsum('oc,bcn->bon', wk, x_flat) + bk[None, :, None]      # (B, C8, N)
    v = jnp.einsum('oc,bcn->bon', wv, x_flat) + bv[None, :, None]      # (B, C, N)
    proj_query = q.transpose(0, 2, 1)                                  # (B, N, C8)
    energy = jnp.einsum('bic,bcj->bij', proj_query, k)                 # (B, N, N)
    attn = jax.nn.softmax(energy, axis=-1)
    out = jnp.einsum('bcj,bij->bci', v, attn)                          # (B, C, N)
    out = out.reshape(B, C, W, H)
    out = gamma[0] * out + x_nchw
    return out, attn


if __name__ == "__main__":
    # Small shapes consistent with the module (in_dim // 8 must be >= 1).
    B, C, W, H = 2, 16, 16, 16
    C8 = C // 8
    N = W * H

    key = jax.random.PRNGKey(0)
    kx, kwq, kbq, kwk, kbk, kwv, kbv = jax.random.split(key, 7)

    x = jax.random.normal(kx, (B, C, W, H), dtype=jnp.float32)

    # 1x1 conv weights stored as (out_ch, in_ch) since kernel_size=1.
    wq = 0.1 * jax.random.normal(kwq, (C8, C), dtype=jnp.float32)
    bq = 0.1 * jax.random.normal(kbq, (C8,), dtype=jnp.float32)
    wk = 0.1 * jax.random.normal(kwk, (C8, C), dtype=jnp.float32)
    bk = 0.1 * jax.random.normal(kbk, (C8,), dtype=jnp.float32)
    wv = 0.1 * jax.random.normal(kwv, (C, C), dtype=jnp.float32)
    bv = 0.1 * jax.random.normal(kbv, (C,), dtype=jnp.float32)
    # Module inits gamma to zero; use a nonzero value so the residual path is
    # actually exercised (semantics: out = gamma*attn_out + x).
    gamma = jnp.array([0.5], dtype=jnp.float32)

    # max_tq=128 forces two query tiles (N=256) so the tiled path is exercised.
    out, attn = self_attn_forward(x, wq, bq, wk, bk, wv, bv, gamma, max_tq=128)
    jax.block_until_ready((out, attn))

    out_ref, attn_ref = self_attn_reference(x, wq, bq, wk, bk, wv, bv, gamma)
    assert out.shape == (B, C, W, H)
    assert attn.shape == (B, N, N)
    # bf16 MXU operands, bf16 attention store, and the approximate reciprocal
    # -> compare against the f32 reference with relaxed tolerances.
    assert jnp.allclose(attn.astype(jnp.float32), attn_ref, atol=1e-2, rtol=1e-2)
    assert jnp.allclose(out, out_ref, atol=2e-2, rtol=2e-2)

    print("KERNEL_OK")
</pallas_src>

<mosaic_0001>
module attributes {stable_mosaic.version = 11 : i64} {
  func.func @self_attn_kernel(%arg0: i32, %arg1: i32, %arg2: memref<1x128x128xbf16, #tpu.memory_space<vmem>>, %arg3: memref<1x256x128xbf16, #tpu.memory_space<vmem>>, %arg4: memref<1x256x16xbf16, #tpu.memory_space<vmem>>, %arg5: memref<1x128x16xf32, #tpu.memory_space<vmem>>, %arg6: memref<1xf32, #tpu.memory_space<smem>>, %arg7: memref<1x128x16xf32, #tpu.memory_space<vmem>>, %arg8: memref<1x128x256xbf16, #tpu.memory_space<vmem>>) attributes {dimension_semantics = [#tpu.dimension_semantics<parallel>, #tpu.dimension_semantics<parallel>], iteration_bounds = array<i64: 2, 2>, scalar_prefetch = 0 : i64, scratch_operands = 0 : i64, tpu.core_type = #tpu.core_type<tc>, window_params = [{transform_indices = @transform_0, window_bounds = array<i64: 1, 128, 128>}, {transform_indices = @transform_1, window_bounds = array<i64: 1, 256, 128>}, {transform_indices = @transform_2, window_bounds = array<i64: 1, 256, 16>}, {transform_indices = @transform_3, window_bounds = array<i64: 1, 128, 16>}, {transform_indices = @transform_4, window_bounds = array<i64: 1>}, {transform_indices = @transform_5, window_bounds = array<i64: 1, 128, 16>}, {transform_indices = @transform_6, window_bounds = array<i64: 1, 128, 256>}]} {
    %c0 = arith.constant 0 : index
    %c0_0 = arith.constant 0 : index
    %c0_1 = arith.constant 0 : index
    %0 = vector.load %arg2[%c0, %c0_0, %c0_1] : memref<1x128x128xbf16, #tpu.memory_space<vmem>>, vector<1x128x128xbf16>
    %1 = vector.shape_cast %0 : vector<1x128x128xbf16> to vector<128x128xbf16>
    %c0_2 = arith.constant 0 : index
    %c0_3 = arith.constant 0 : index
    %c0_4 = arith.constant 0 : index
    %2 = vector.load %arg3[%c0_2, %c0_3, %c0_4] : memref<1x256x128xbf16, #tpu.memory_space<vmem>>, vector<1x256x128xbf16>
    %3 = vector.shape_cast %2 : vector<1x256x128xbf16> to vector<256x128xbf16>
    %cst = arith.constant dense<0.000000e+00> : vector<128x256xf32>
    %4 = tpu.matmul %1, %3, %cst {dimension_numbers = #tpu.dot_dimension_numbers<[1], [1], [0], [0], [0, 0, 1, 0], [], []>} : vector<128x128xbf16>, vector<256x128xbf16>, vector<128x256xf32> -> vector<128x256xf32>
    %cst_5 = arith.constant dense<0xFF800000> : vector<128xf32>
    %5 = vector.multi_reduction <maximumf>, %4, %cst_5 [1] : vector<128x256xf32> to vector<128xf32>
    %6 = vector.shape_cast %5 : vector<128xf32> to vector<128x1xf32>
    %7 = vector.broadcast %6 : vector<128x1xf32> to vector<128x256xf32>
    %8 = arith.subf %4, %7 : vector<128x256xf32>
    %9 = math.exp %8 : vector<128x256xf32>
    %cst_6 = arith.constant dense<0.000000e+00> : vector<128xf32>
    %10 = vector.multi_reduction <add>, %9, %cst_6 [1] : vector<128x256xf32> to vector<128xf32>
    %11 = vector.shape_cast %10 : vector<128xf32> to vector<128x1xf32>
    %12 = tpu.reciprocal %11 {approx = true} : vector<128x1xf32> -> vector<128x1xf32>
    %13 = vector.broadcast %12 : vector<128x1xf32> to vector<128x256xf32>
    %14 = arith.mulf %9, %13 : vector<128x256xf32>
    %15 = arith.truncf %14 : vector<128x256xf32> to vector<128x256xbf16>
    %c0_7 = arith.constant 0 : index
    %c0_8 = arith.constant 0 : index
    %c0_9 = arith.constant 0 : index
    %16 = vector.load %arg8[%c0_7, %c0_8, %c0_9] : memref<1x128x256xbf16, #tpu.memory_space<vmem>>, vector<1x128x256xbf16>
    %17 = vector.shape_cast %16 : vector<1x128x256xbf16> to vector<128x256xbf16>
    %18 = vector.shape_cast %15 : vector<128x256xbf16> to vector<1x128x256xbf16>
    tpu.vector_store %arg8[%c0_7, %c0_8, %c0_9], %18 {strides = array<i32>} : memref<1x128x256xbf16, #tpu.memory_space<vmem>>, vector<1x128x256xbf16>,
    %19 = arith.truncf %14 : vector<128x256xf32> to vector<128x256xbf16>
    %c0_10 = arith.constant 0 : index
    %c0_11 = arith.constant 0 : index
    %c0_12 = arith.constant 0 : index
    %20 = vector.load %arg4[%c0_10, %c0_11, %c0_12] : memref<1x256x16xbf16, #tpu.memory_space<vmem>>, vector<1x256x16xbf16>
    %21 = vector.shape_cast %20 : vector<1x256x16xbf16> to vector<256x16xbf16>
    %cst_13 = arith.constant dense<0.000000e+00> : vector<128x16xf32>
    %22 = tpu.matmul %19, %21, %cst_13 {dimension_numbers = #tpu.dot_dimension_numbers<[1], [0], [0], [1], [0, 0, 1, 1], [], []>} : vector<128x256xbf16>, vector<256x16xbf16>, vector<128x16xf32> -> vector<128x16xf32>
    %c0_14 = arith.constant 0 : index
    %23 = memref.load %arg6[%c0_14] : memref<1xf32, #tpu.memory_space<smem>>
    %24 = vector.broadcast %23 : f32 to vector<128x16xf32>
    %25 = arith.mulf %24, %22 : vector<128x16xf32>
    %c0_15 = arith.constant 0 : index
    %c0_16 = arith.constant 0 : index
    %c0_17 = arith.constant 0 : index
    %26 = vector.load %arg5[%c0_15, %c0_16, %c0_17] : memref<1x128x16xf32, #tpu.memory_space<vmem>>, vector<1x128x16xf32>
    %27 = vector.shape_cast %26 : vector<1x128x16xf32> to vector<128x16xf32>
    %28 = arith.addf %25, %27 : vector<128x16xf32>
    %c0_18 = arith.constant 0 : index
    %c0_19 = arith.constant 0 : index
    %c0_20 = arith.constant 0 : index
    %29 = vector.load %arg7[%c0_18, %c0_19, %c0_20] : memref<1x128x16xf32, #tpu.memory_space<vmem>>, vector<1x128x16xf32>
    %30 = vector.shape_cast %29 : vector<1x128x16xf32> to vector<128x16xf32>
    %31 = vector.shape_cast %28 : vector<128x16xf32> to vector<1x128x16xf32>
    tpu.vector_store %arg7[%c0_18, %c0_19, %c0_20], %31 {strides = array<i32>} : memref<1x128x16xf32, #tpu.memory_space<vmem>>, vector<1x128x16xf32>,
    return
  }
  func.func @transform_0(%arg0: i32, %arg1: i32) -> (i32, i32, i32) {
    %c0_i32 = arith.constant 0 : i32
    %c0_i32_0 = arith.constant 0 : i32
    return %arg0, %arg1, %c0_i32 : i32, i32, i32
  }
  func.func @transform_1(%arg0: i32, %arg1: i32) -> (i32, i32, i32) {
    %c0_i32 = arith.constant 0 : i32
    %c0_i32_0 = arith.constant 0 : i32
    %c0_i32_1 = arith.constant 0 : i32
    return %arg0, %c0_i32, %c0_i32_0 : i32, i32, i32
  }
  func.func @transform_2(%arg0: i32, %arg1: i32) -> (i32, i32, i32) {
    %c0_i32 = arith.constant 0 : i32
    %c0_i32_0 = arith.constant 0 : i32
    %c0_i32_1 = arith.constant 0 : i32
    return %arg0, %c0_i32, %c0_i32_0 : i32, i32, i32
  }
  func.func @transform_3(%arg0: i32, %arg1: i32) -> (i32, i32, i32) {
    %c0_i32 = arith.constant 0 : i32
    %c0_i32_0 = arith.constant 0 : i32
    return %arg0, %arg1, %c0_i32 : i32, i32, i32
  }
  func.func @transform_4(%arg0: i32, %arg1: i32) -> i32 {
    %c0_i32 = arith.constant 0 : i32
    %c0_i32_0 = arith.constant 0 : i32
    return %c0_i32 : i32
  }
  func.func @transform_5(%arg0: i32, %arg1: i32) -> (i32, i32, i32) {
    %c0_i32 = arith.constant 0 : i32
    %c0_i32_0 = arith.constant 0 : i32
    return %arg0, %arg1, %c0_i32 : i32, i32, i32
  }
  func.func @transform_6(%arg0: i32, %arg1: i32) -> (i32, i32, i32) {
    %c0_i32 = arith.constant 0 : i32
    %c0_i32_0 = arith.constant 0 : i32
    return %arg0, %arg1, %c0_i32 : i32, i32, i32
  }
}

</mosaic_0001>

<bundles_post_ra>
// kernel: tpu_custom_call.1
= control target key start
LH: loop header
LB: loop body
LE: loop exit
PB: predicated region body
PF: predicated region fallthrough
CT: control target
= control target key end

     0   :  { %s2621_s0 = inlined_call_operand.vmem [shape: bf16[2,256,128], index: 0, kind: input, shape index: {}]   ;;  %s2622_s1 = inlined_call_operand.vmem [shape: bf16[2,256,128], index: 1, kind: input, shape index: {}]   ;;  %s2623_s2 = inlined_call_operand.vmem [shape: bf16[2,256,16], index: 2, kind: input, shape index: {}]   ;;  %s2624_s3 = inlined_call_operand.vmem [shape: f32[2,256,16], index: 3, kind: input, shape index: {}]   ;;  %s2625_s4 = inlined_call_operand.<no memory space> [shape: f32[1], index: 4, kind: input, shape index: {}]   ;;  %s2626_s5 = inlined_call_operand.vmem [shape: f32[2,256,16], index: 5, kind: output, shape index: {0}]   ;;  %s2627_s6 = inlined_call_operand.hbm [shape: bf16[2,256,256], index: 6, kind: output, shape index: {1}]  }
   0x1   :  { %2628 = sst [smem:[#allocation6_spill]] %s2621_s0 }
   0x2   :  { %12 = sst [smem:[#allocation2]] %s2625_s4 }
   0x3   :  { %13 = vsyncpa [#allocation4], 0 }
   0x4   :  { %15 = vsyncpa [#allocation4 + $0x1], 0  ;;  %s2064_s23 = smov 0   ;;  %s2066_s24 = smov 0  }
   0x5   :  { %s2068_s25 = smov 0   ;;  %s2070_s26 = smov 0  }
   0x6   :  { %s2072_s27 = smov 0   ;;  %s2074_s28 = smov 0  }
   0x7   :  { %s2076_s29 = smov 0   ;;  %s2078_s30 = smov 0  }
   0x8 LB: > { %s1523_s4 = sadd.s32 4294967295, %s2021_s30   ;;  %s1524_s7 = sadd.s32 4294967294, %s2021_s30   ;;  %s2021_s30 = sphi %s2078_s30, %s21_s30   ;;  %s2017_s29 = sphi %s2076_s29, %s2638_s29   ;;  %s2013_s28 = sphi %s2074_s28, %s2637_s28   ;;  %s2009_s27 = sphi %s2072_s27, %s2636_s27   ;;  %s2005_s26 = sphi %s2070_s26, %s2635_s26   ;;  %s2001_s25 = sphi %s2068_s25, %s2634_s25   ;;  %s1997_s24 = sphi %s2066_s24, %s2633_s24   ;;  %s1993_s23 = sphi %s2064_s23, %s2632_s23  }
   0x9   : > { %s30_s8 = sadd.s32 1, %s2013_s28  ;;  %s33_s9 = sadd.s32 1, %s2017_s29 }
   0xa   : > { %p31_p0 = scmp.ge.s32.totalorder %s30_s8, 2  ;;  %p209_p1 = scmp.ne.s32.totalorder %s2001_s25, %s1997_s24 }
   0xb   : > { %p210_p2 = scmp.eq.s32.totalorder %s1523_s4, 3  ;;  %p215_p5 = scmp.ne.s32.totalorder %s1997_s24, %s1993_s23 }
   0xc   : > { %s2640_s8 = smov (%p31_p0, %s30_s8), 0  ;;  %s2642_s9 = smov (!%p31_p0, %s33_s9), %s2017_s29 }
   0xd   : > { %s195_s10 = ssub.s32 %s2013_s28, %s2640_s8  ;;  %p2115_p3 = por %p210_p2, %p209_p1 }
   0xe   : > { %p35_p4 = scmp.ge.s32.totalorder %s2642_s9, 2  ;;  %p216_p6 = scmp.eq.s32.totalorder %s1524_s7, 3 }
   0xf   : > { %p1527_p7 = scmp.ge.s32.totalorder %s2021_s30, 1  ;;  %p279_p9 = scmp.lt.s32.totalorder %s2021_s30, 5 }
  0x10   : > { %s2644_s9 = smov (%p35_p4, %s2642_s9), 0  ;;  %p2124_p8 = por %p216_p6, %p215_p5 }
  0x11   : > { %s194_s13 = ssub.s32 %s2017_s29, %s2644_s9  ;;  %s199_s14 = sadd.s32 1, %s2001_s25 }
  0x12   : > { %s196_s15 = sor.u32 %s195_s10, %s194_s13  ;;  %p280_p10 = pnand %p1527_p7, %p279_p9 }
  0x13   : > { %p197_p11 = scmp.eq.s32.totalorder %s196_s15, 0  ;;  %p342_p12 = scmp.lt.s32.totalorder (!%p280_p10), %s2009_s27, 1 }
  0x14   : > { %283 = sbr.rel (%p280_p10) target bundleno = 873 (0x369), region = 40  ;;  %s1529_s17 = sshll.u32 (!%p280_p10), %s2005_s26, 4 }
  0x15   : > { %s2133_s16 = scalar_select %p197_p11, %s2001_s25, %s199_s14  }
  0x16   : > { %p344_p13 = scmp.lt.s32.totalorder (!%p280_p10), %s1529_s17, 31  ;;  %s2631_s0 = sld [smem:[#allocation6_spill]] (!%p280_p10) }
  0x19   : > { %s2138_s18 = scalar_select %p342_p12, %s2009_s27, 1 }
  0x1a   : > { %s2646_s17 = smov (!%p344_p13, %s1529_s17), 31 }
  0x1b   : > { %s1605_s19 = sshll.u32 %s2138_s18, 7  ;;  %s1530_s4 = sshll.u32 %s2138_s18, 5 }
  0x1c   : > { %s2146_s22 = scalar_lea.vmem %s2622_s1, %s1605_s19  ;;  %s2153_s7 = sadd.s32 %s1530_s4, %s2646_s17 }
  0x1d   : > { %v1793_v0 = vld [vmem:[%s2146_s22 + $0x78] sm:$0xff]   ;;  %v1795_v2 = vld [vmem:[%s2146_s22 + $0x70] sm:$0xff]   ;;  %v1797_v4 = vld [vmem:[%s2146_s22 + $0x68] sm:$0xff]   ;;  %s1531_s10 = sshll.u32 %s2153_s7, 2  ;;  %s2282_s21 = scalar_lea.vmem %s2623_s2, %s1605_s19 }
  0x1e   : > { %v1794_v1 = vld [vmem:[%s2146_s22 + $0x38] sm:$0xff]   ;;  %1624 = vmatprep.subr.bf16.mxu0 %v1793_v0  ;;  %v1796_v3 = vld [vmem:[%s2146_s22 + $0x30] sm:$0xff]   ;;  %s2160_s15 = scalar_lea.vmem %s2631_s0, %s1531_s10  ;;  %v1798_v5 = vld [vmem:[%s2146_s22 + $0x28] sm:$0xff]   ;;  %s338_s18 = sand.u32 1, %s1997_s24  }
  0x1f   : > { %1625 = vmatpush3.bf16.xpose.msra.mxu0 %v1794_v1  ;;  %v1799_v6 = vld [vmem:[%s2146_s22 + $0x60] sm:$0xff]   ;;  %v1801_v9 = vld [vmem:[%s2146_s22 + $0x58] sm:$0xff]   ;;  %v1803_v11 = vld [vmem:[%s2146_s22 + $0x50] sm:$0xff]   ;;  %s1528_s19 = sshll.u32 %s338_s18, 7  ;;  %s1623_s4 = sshll.u32 %s2005_s26, 5 }
  0x20   : > { %1626 = vmatprep.subr.bf16.mxu0 %v1795_v2  ;;  %v1809_v7 = vld [vmem:[%s2160_s15] sm:$0xff]   ;;  %v1802_v10 = vld [vmem:[%s2146_s22 + $0x18] sm:$0xff]   ;;  %v1804_v12 = vld [vmem:[%s2146_s22 + $0x10] sm:$0xff]   ;;  %s1601_s10 = sshll.u32 %s2009_s27, 6  ;;  %s2023_s26 = smov [#allocation3]  }
  0x21   : > { %1640 = vmatprep.mubr.bf16.mxu0 %v1809_v7  ;;  %v1800_v8 = vld [vmem:[%s2146_s22 + $0x20] sm:$0xff]   ;;  %v1805_v13 = vld [vmem:[%s2146_s22 + $0x48] sm:$0xff]   ;;  %v1811_v18 = vld [vmem:[%s2160_s15 + $0x10] sm:$0xff]   ;;  %s1359_s13 = sadd.s32 %s1623_s4, %s1601_s10  ;;  %s1933_s27 = sshll.u32 %s2023_s26, 4  ;;  %s1934_s27 = int_to_ptr.vmem [resolvable:$false] %s1933_s27 }
  0x22   : > { %v1806_v14 = vld [vmem:[%s2146_s22 + $0x8] sm:$0xff]   ;;  %v1807_v15 = vld [vmem:[%s2146_s22 + $0x40] sm:$0xff]   ;;  %v1812_v19 = vld [vmem:[%s2160_s15 + $0x18] sm:$0xff]   ;;  %s1602_s14 = sshll.u32 %s1359_s13, 6 }
  0x23   : > { %v1808_v16 = vld [vmem:[%s2146_s22] sm:$0xff]   ;;  %v1810_v17 = vld [vmem:[%s2160_s15 + $0x8] sm:$0xff]   ;;  %v1815_v22 = vld [vmem:[%s2160_s15 + $0x30] sm:$0xff]   ;;  %s2435_s22 = scalar_lea.vmem [#allocation3], %s1528_s19  ;;  %s2493_s19 = scalar_lea.sflag [#allocation4], %s338_s18 }
  0x24   : > { %v1813_v20 = vld [vmem:[%s2160_s15 + $0x20] sm:$0xff]   ;;  %v1814_v21 = vld [vmem:[%s2160_s15 + $0x28] sm:$0xff]   ;;  %v1816_v23 = vld [vmem:[%s2160_s15 + $0x38] sm:$0xff]   ;;  %s1362_s15 = sshll.u32 %s2435_s22, 4  ;;  %s2489_s15 = int_to_ptr.vmem [resolvable:$true] %s1362_s15 }
  0x25   : > { %s1929_s0 = scalar_lea.vmem %s2489_s15, 2048  ;;  %p1936_p4 = scmp.lt.s32.totalorder %s2489_s15, %s1934_s27 }
  0x26   : > { %p1930_p0 = scmp.ne.s32.totalorder %s2489_s15, %s1929_s0 }
  0x27   : > { %1627 = vmatpush3.bf16.xpose.msra.mxu0 %v1796_v3 }
  0x28   : > { %1628 = vmatprep.subr.bf16.mxu0 %v1797_v4  ;;  %p1931_p1 = pnand %p1930_p0, %p2115_p3 }
  0x2a   : > { %p1932_p2 = pneg %p1931_p1 }
  0x2f   : > { %1629 = vmatpush3.bf16.xpose.msra.mxu0 %v1798_v5 }
  0x30   : > { %1630 = vmatprep.subr.bf16.mxu0 %v1799_v6 }
  0x37   : > { %1631 = vmatpush3.bf16.xpose.msra.mxu0 %v1800_v8  ;;  %v1817_v8 = vld [vmem:[%s2282_s21 + $0x78] sm:$0xff]  }
  0x38   : > { %1632 = vmatprep.subr.bf16.mxu0 %v1801_v9  ;;  %v1818_v9 = vld [vmem:[%s2282_s21 + $0x38] sm:$0xff]   ;;  %1656 = vmatprep.subr.bf16.mxu1 %v1817_v8 }
  0x39   : > { %1657 = vmatpush3.bf16.msra.mxu1 %v1818_v9 }
  0x3f   : > { %1633 = vmatpush3.bf16.xpose.msra.mxu0 %v1802_v10  ;;  %v1819_v10 = vld [vmem:[%s2282_s21 + $0x70] sm:$0xff]  }
  0x40   : > { %1634 = vmatprep.subr.bf16.mxu0 %v1803_v11  ;;  %v1820_v11 = vld [vmem:[%s2282_s21 + $0x30] sm:$0xff]   ;;  %1658 = vmatprep.subr.bf16.mxu1 %v1819_v10 }
  0x41   : > { %1659 = vmatpush3.bf16.msra.mxu1 %v1820_v11 }
  0x47   : > { %1635 = vmatpush3.bf16.xpose.msra.mxu0 %v1804_v12  ;;  %v1821_v12 = vld [vmem:[%s2282_s21 + $0x68] sm:$0xff]  }
  0x48   : > { %1636 = vmatprep.subr.bf16.mxu0 %v1805_v13  ;;  %1660 = vmatprep.subr.bf16.mxu1 %v1821_v12 }
  0x4f   : > { %1637 = vmatpush3.bf16.xpose.msra.mxu0 %v1806_v14 }
  0x50   : > { %1638 = vmatprep.subr.bf16.mxu0 %v1807_v15 }
  0x57   : > { %1639 = vmatpush3.bf16.xpose.msra.mxu0 %v1808_v16 }
  0x5e   : > { %1641 = vmatmul.mubr.bf16.vlgmr.msra.gmra.mxu0 %v1809_v7 }
  0x5f   : > { %1642 = vmatprep.mubr.bf16.mxu0 %v1810_v17 }
  0x66   : > { %1643 = vmatmul.mubr.bf16.gmra.mxu0 %v1810_v17 }
  0x67   : > { %1644 = vmatprep.mubr.bf16.mxu0 %v1811_v18 }
  0x6e   : > { %1645 = vmatmul.mubr.bf16.gmra.mxu0 %v1811_v18 }
  0x6f   : > { %1646 = vmatprep.mubr.bf16.mxu0 %v1812_v19 }
  0x76   : > { %1647 = vmatmul.mubr.bf16.gmra.mxu0 %v1812_v19 }
  0x77   : > { %1648 = vmatprep.mubr.bf16.mxu0 %v1813_v20 }
  0x7e   : > { %1649 = vmatmul.mubr.bf16.gmra.mxu0 %v1813_v20 }
  0x7f   : > { %1650 = vmatprep.mubr.bf16.mxu0 %v1814_v21 }
  0x86   : > { %1651 = vmatmul.mubr.bf16.gmra.mxu0 %v1814_v21 }
  0x87   : > { %1652 = vmatprep.mubr.bf16.mxu0 %v1815_v22 }
  0x8e   : > { %1653 = vmatmul.mubr.bf16.gmra.mxu0 %v1815_v22 }
  0x8f   : > { %1654 = vmatprep.mubr.bf16.mxu0 %v1816_v23 }
  0x96   : > { %1655 = vmatmul.mubr.bf16.gmra.mxu0 %v1816_v23 }
 0x11e   : > { %v2181_v24 = vpop.f32.mrf.mxu0 }
 0x120   : > { %v2183_v25 = vpop.f32.mrf.mxu0 }
 0x121   : > { %v688_v26 = vmax.f32 %v2181_v24, %v2183_v25 }
 0x122   : > { %v2187_v27 = vpop.f32.mrf.mxu0 }
 0x123   : > { %689 = vmax.xlane.f32.xlu0 %v688_v26 }
 0x124   : > { %v2189_v28 = vpop.f32.mrf.mxu0 }
 0x125   : > { %v691_v29 = vmax.f32 %v2187_v27, %v2189_v28 }
 0x126   : > { %v2193_v30 = vpop.f32.mrf.mxu0 }
 0x127   : > { %692 = vmax.xlane.f32.xlu0 %v691_v29 }
 0x128   : > { %v2195_v31 = vpop.f32.mrf.mxu0 }
 0x129   : > { %v694_v32 = vmax.f32 %v2193_v30, %v2195_v31 }
 0x12a   : > { %v2199_v33 = vpop.f32.mrf.mxu0 }
 0x12b   : > { %695 = vmax.xlane.f32.xlu1 %v694_v32 }
 0x12c   : > { %v2201_v34 = vpop.f32.mrf.mxu0 }
 0x12d   : > { %v697_v35 = vmax.f32 %v2199_v33, %v2201_v34 }
 0x12e   : > { %v2205_v36 = vpop.f32.mrf.mxu0 }
 0x12f   : > { %698 = vmax.xlane.f32.xlu1 %v697_v35 }
 0x130   : > { %v2207_v37 = vpop.f32.mrf.mxu0 }
 0x131   : > { %v700_v38 = vmax.f32 %v2205_v36, %v2207_v37 }
 0x132   : > { %v2211_v39 = vpop.f32.mrf.mxu0 }
 0x133   : > { %701 = vmax.xlane.f32.xlu0 %v700_v38 }
 0x134   : > { %v2213_v40 = vpop.f32.mrf.mxu0 }
 0x135   : > { %v703_v41 = vmax.f32 %v2211_v39, %v2213_v40 }
 0x136   : > { %v2217_v42 = vpop.f32.mrf.mxu0 }
 0x137   : > { %704 = vmax.xlane.f32.xlu1 %v703_v41 }
 0x138   : > { %v2219_v43 = vpop.f32.mrf.mxu0 }
 0x139   : > { %v706_v44 = vmax.f32 %v2217_v42, %v2219_v43 }
 0x13a   : > { %v2223_v45 = vpop.f32.mrf.mxu0 }
 0x13b   : > { %707 = vmax.xlane.f32.xlu0 %v706_v44 }
 0x13c   : > { %v2225_v46 = vpop.f32.mrf.mxu0 }
 0x13d   : > { %v709_v47 = vmax.f32 %v2223_v45, %v2225_v46 }
 0x13e   : > { %v2229_v48 = vpop.f32.mrf.mxu0 }
 0x13f   : > { %710 = vmax.xlane.f32.xlu1 %v709_v47 }
 0x140   : > { %v2231_v49 = vpop.f32.mrf.mxu0 }
 0x141   : > { %v712_v50 = vmax.f32 %v2229_v48, %v2231_v49 }
 0x142   : > { %v2235_v51 = vpop.f32.mrf.mxu0 }
 0x143   : > { %713 = vmax.xlane.f32.xlu0 %v712_v50 }
 0x144   : > { %v2237_v52 = vpop.f32.mrf.mxu0 }
 0x145   : > { %v715_v53 = vmax.f32 %v2235_v51, %v2237_v52 }
 0x146   : > { %v2241_v54 = vpop.f32.mrf.mxu0 }
 0x147   : > { %716 = vmax.xlane.f32.xlu1 %v715_v53 }
 0x148   : > { %v2243_v55 = vpop.f32.mrf.mxu0 }
 0x149   : > { %v718_v56 = vmax.f32 %v2241_v54, %v2243_v55 }
 0x14a   : > { %v2247_v57 = vpop.f32.mrf.mxu0 }
 0x14b   : > { %719 = vmax.xlane.f32.xlu0 %v718_v56 }
 0x14c   : > { %v2249_v58 = vpop.f32.mrf.mxu0 }
 0x14d   : > { %v721_v59 = vmax.f32 %v2247_v57, %v2249_v58 }
 0x14e   : > { %v2253_v60 = vpop.f32.mrf.mxu0 }
 0x14f   : > { %722 = vmax.xlane.f32.xlu1 %v721_v59 }
 0x150   : > { %v2255_v61 = vpop.f32.mrf.mxu0 }
 0x151   : > { %v724_v62 = vmax.f32 %v2253_v60, %v2255_v61 }
 0x152   : > { %v2259_v63 = vpop.f32.mrf.mxu0 }
 0x153   : > { %725 = vmax.xlane.f32.xlu0 %v724_v62 }
 0x154   : > { %v2261_v0 = vpop.f32.mrf.mxu0 }
 0x155   : > { %v727_v1 = vmax.f32 %v2259_v63, %v2261_v0 }
 0x156   : > { %v2265_v2 = vpop.f32.mrf.mxu0 }
 0x157   : > { %728 = vmax.xlane.f32.xlu1 %v727_v1 }
 0x158   : > { %v2267_v3 = vpop.f32.mrf.mxu0 }
 0x159   : > { %v730_v4 = vmax.f32 %v2265_v2, %v2267_v3 }
 0x15a   : > { %v2271_v5 = vpop.f32.mrf.mxu0 }
 0x15b   : > { %731 = vmax.xlane.f32.xlu0 %v730_v4 }
 0x15c   : > { %v2273_v6 = vpop.f32.mrf.mxu0 }
 0x15d   : > { %v733_v7 = vmax.f32 %v2271_v5, %v2273_v6 }
 0x15f   : > { %734 = vmax.xlane.f32.xlu1 %v733_v7 }
 0x1ac   : > { %v690_v13 = vpop.xlane.xlu0 %689 }
 0x1ad   : > { %v736_v14 = vsub.f32 %v2181_v24, %v690_v13  ;;  %v737_v15 = vsub.f32 %v2183_v25, %v690_v13 }
 0x1af   : > { %v768_v16 = vmul.f32 1.442695, %v736_v14  ;;  %v770_v17 = vmul.f32 1.442695, %v737_v15 }
 0x1b0   : > { %v693_v18 = vpop.xlane.xlu0 %692 }
 0x1b1   : > { %1833 = vpow2.f32 %v768_v16  ;;  %v738_v19 = vsub.f32 %v2187_v27, %v693_v18  ;;  %v739_v20 = vsub.f32 %v2189_v28, %v693_v18 }
 0x1b2   : > { %1835 = vpow2.f32 %v770_v17 }
 0x1b3   : > { %v772_v21 = vmul.f32 1.442695, %v738_v19  ;;  %v774_v22 = vmul.f32 1.442695, %v739_v20 }
 0x1b4   : > { %v696_v23 = vpop.xlane.xlu1 %695 }
 0x1b5   : > { %1837 = vpow2.f32 %v772_v21  ;;  %v740_v26 = vsub.f32 %v2193_v30, %v696_v23  ;;  %v741_v29 = vsub.f32 %v2195_v31, %v696_v23  ;;  %v1823_v21 = vld [vmem:[%s2282_s21 + $0x60] sm:$0xff]  }
 0x1b6   : > { %1839 = vpow2.f32 %v774_v22  ;;  %v1824_v23 = vld [vmem:[%s2282_s21 + $0x20] sm:$0xff]  }
 0x1b7   : > { %v776_v24 = vmul.f32 1.442695, %v740_v26  ;;  %v778_v25 = vmul.f32 1.442695, %v741_v29 }
 0x1b8   : > { %v699_v32 = vpop.xlane.xlu1 %698 }
 0x1b9   : > { %1841 = vpow2.f32 %v776_v24  ;;  %v742_v35 = vsub.f32 %v2199_v33, %v699_v32  ;;  %v743_v27 = vsub.f32 %v2201_v34, %v699_v32 }
 0x1ba   : > { %1843 = vpow2.f32 %v778_v25 }
 0x1bb   : > { %v780_v28 = vmul.f32 1.442695, %v742_v35  ;;  %v782_v38 = vmul.f32 1.442695, %v743_v27 }
 0x1bc   : > { %v702_v41 = vpop.xlane.xlu0 %701 }
 0x1bd   : > { %1845 = vpow2.f32 %v780_v28  ;;  %v744_v44 = vsub.f32 %v2205_v36, %v702_v41  ;;  %v745_v30 = vsub.f32 %v2207_v37, %v702_v41  ;;  %v1826_v28 = vld [vmem:[%s2282_s21 + $0x18] sm:$0xff]  }
 0x1be   : > { %v2299_v47 = vpop.eup %1833  ;;  %1847 = vpow2.f32 %v782_v38 }
 0x1bf   : > { %v2301_v31 = vpop.eup %1835  ;;  %v784_v50 = vmul.f32 1.442695, %v744_v44  ;;  %v786_v53 = vmul.f32 1.442695, %v745_v30 }
 0x1c0   : > { %v705_v56 = vpop.xlane.xlu1 %704  ;;  %v832_v33 = vadd.f32 %v2301_v31, %v2299_v47 }
 0x1c1   : > { %1849 = vpow2.f32 %v784_v50  ;;  %v746_v34 = vsub.f32 %v2211_v39, %v705_v56  ;;  %v747_v59 = vsub.f32 %v2213_v40, %v705_v56 }
 0x1c2   : > { %v2307_v62 = vpop.eup %1837  ;;  %1851 = vpow2.f32 %v786_v53  ;;  %833 = vadd.xlane.f32.xlu0 %v832_v33  ;;  %v1828_v33 = vld [vmem:[%s2282_s21 + $0x10] sm:$0xff]  }
 0x1c3   : > { %v2309_v36 = vpop.eup %1839  ;;  %v788_v37 = vmul.f32 1.442695, %v746_v34  ;;  %v790_v1 = vmul.f32 1.442695, %v747_v59 }
 0x1c4   : > { %v708_v4 = vpop.xlane.xlu0 %707  ;;  %v835_v7 = vadd.f32 %v2309_v36, %v2307_v62 }
 0x1c5   : > { %1853 = vpow2.f32 %v788_v37  ;;  %v748_v8 = vsub.f32 %v2217_v42, %v708_v4  ;;  %v749_v39 = vsub.f32 %v2219_v43, %v708_v4  ;;  %v1822_v43 = vld [vmem:[%s2282_s21 + $0x28] sm:$0xff]  }
 0x1c6   : > { %v2315_v9 = vpop.eup %1841  ;;  %1855 = vpow2.f32 %v790_v1  ;;  %836 = vadd.xlane.f32.xlu1 %v835_v7  ;;  %1661 = vmatpush3.bf16.msra.mxu1 %v1822_v43 }
 0x1c7   : > { %v2317_v40 = vpop.eup %1843  ;;  %v792_v10 = vmul.f32 1.442695, %v748_v8  ;;  %v794_v11 = vmul.f32 1.442695, %v749_v39  ;;  %1662 = vmatprep.subr.bf16.mxu1 %v1823_v21  ;;  %v1830_v39 = vld [vmem:[%s2282_s21 + $0x8] sm:$0xff]  }
 0x1c8   : > { %v711_v12 = vpop.xlane.xlu1 %710  ;;  %v838_v13 = vadd.f32 %v2317_v40, %v2315_v9 }
 0x1c9   : > { %1857 = vpow2.f32 %v792_v10  ;;  %v750_v14 = vsub.f32 %v2223_v45, %v711_v12  ;;  %v751_v42 = vsub.f32 %v2225_v46, %v711_v12 }
 0x1ca   : > { %v2323_v15 = vpop.eup %1845  ;;  %1859 = vpow2.f32 %v794_v11  ;;  %839 = vadd.xlane.f32.xlu0 %v838_v13  ;;  %1663 = vmatpush3.bf16.msra.mxu1 %v1824_v23 }
 0x1cb   : > { %v2326_v16 = vpop.eup %1847  ;;  %v796_v17 = vmul.f32 1.442695, %v750_v14  ;;  %v798_v18 = vmul.f32 1.442695, %v751_v42  ;;  %v1831_v42 = vld [vmem:[%s2282_s21 + $0x40] sm:$0xff]  }
 0x1cc   : > { %v714_v19 = vpop.xlane.xlu0 %713  ;;  %v841_v20 = vadd.f32 %v2326_v16, %v2323_v15 }
 0x1cd   : > { %1861 = vpow2.f32 %v796_v17  ;;  %v752_v45 = vsub.f32 %v2229_v48, %v714_v19  ;;  %v753_v46 = vsub.f32 %v2231_v49, %v714_v19  ;;  %v1825_v48 = vld [vmem:[%s2282_s21 + $0x58] sm:$0xff]   ;;  %v1832_v17 = vld [vmem:[%s2282_s21] sm:$0xff]  }
 0x1ce   : > { %v2333_v22 = vpop.eup %1849  ;;  %1863 = vpow2.f32 %v798_v18  ;;  %842 = vadd.xlane.f32.xlu1 %v841_v20  ;;  %1664 = vmatprep.subr.bf16.mxu1 %v1825_v48 }
 0x1cf   : > { %v2336_v26 = vpop.eup %1851  ;;  %v800_v29 = vmul.f32 1.442695, %v752_v45  ;;  %v802_v24 = vmul.f32 1.442695, %v753_v46  ;;  %1665 = vmatpush3.bf16.msra.mxu1 %v1826_v28 }
 0x1d0   : > { %v717_v25 = vpop.xlane.xlu1 %716  ;;  %v844_v32 = vadd.f32 %v2336_v26, %v2333_v22 }
 0x1d1   : > { %1865 = vpow2.f32 %v800_v29  ;;  %v754_v49 = vsub.f32 %v2235_v51, %v717_v25  ;;  %v755_v35 = vsub.f32 %v2237_v52, %v717_v25  ;;  %v1827_v51 = vld [vmem:[%s2282_s21 + $0x50] sm:$0xff]  }
 0x1d2   : > { %v2343_v27 = vpop.eup %1853  ;;  %1867 = vpow2.f32 %v802_v24  ;;  %845 = vadd.xlane.f32.xlu0 %v844_v32  ;;  %1666 = vmatprep.subr.bf16.mxu1 %v1827_v51 }
 0x1d3   : > { %v2346_v38 = vpop.eup %1855  ;;  %v804_v41 = vmul.f32 1.442695, %v754_v49  ;;  %v806_v44 = vmul.f32 1.442695, %v755_v35  ;;  %1667 = vmatpush3.bf16.msra.mxu1 %v1828_v33 }
 0x1d4   : > { %v720_v30 = vpop.xlane.xlu0 %719  ;;  %v847_v50 = vadd.f32 %v2346_v38, %v2343_v27 }
 0x1d5   : > { %1869 = vpow2.f32 %v804_v41  ;;  %v756_v52 = vsub.f32 %v2241_v54, %v720_v30  ;;  %v757_v53 = vsub.f32 %v2243_v55, %v720_v30  ;;  %v1829_v54 = vld [vmem:[%s2282_s21 + $0x48] sm:$0xff]   ;;  %s2487_s21 = scalar_lea.hbm %s2627_s6, %s1602_s14 }
 0x1d6   : > { %v2353_v56 = vpop.eup %1857  ;;  %1871 = vpow2.f32 %v806_v44  ;;  %848 = vadd.xlane.f32.xlu1 %v847_v50  ;;  %1668 = vmatprep.subr.bf16.mxu1 %v1829_v54 }
 0x1d7   : > { %v2356_v34 = vpop.eup %1859  ;;  %v808_v59 = vmul.f32 1.442695, %v756_v52  ;;  %v810_v37 = vmul.f32 1.442695, %v757_v53  ;;  %1669 = vmatpush3.bf16.msra.mxu1 %v1830_v39 }
 0x1d8   : > { %v723_v1 = vpop.xlane.xlu1 %722  ;;  %v850_v4 = vadd.f32 %v2356_v34, %v2353_v56  ;;  %1670 = vmatprep.subr.bf16.mxu1 %v1831_v42 }
 0x1d9   : > { %1873 = vpow2.f32 %v808_v59  ;;  %v758_v55 = vsub.f32 %v2247_v57, %v723_v1  ;;  %v759_v7 = vsub.f32 %v2249_v58, %v723_v1 }
 0x1da   : > { %v2363_v8 = vpop.eup %1861  ;;  %1875 = vpow2.f32 %v810_v37  ;;  %851 = vadd.xlane.f32.xlu0 %v850_v4 }
 0x1db   : > { %v2366_v10 = vpop.eup %1863  ;;  %v812_v11 = vmul.f32 1.442695, %v758_v55  ;;  %v814_v12 = vmul.f32 1.442695, %v759_v7  ;;  %1671 = vmatpush3.bf16.msra.mxu1 %v1832_v17 }
 0x1dc   : > { %v726_v13 = vpop.xlane.xlu0 %725  ;;  %v853_v14 = vadd.f32 %v2366_v10, %v2363_v8 }
 0x1dd   : > { %1877 = vpow2.f32 %v812_v11  ;;  %v760_v57 = vsub.f32 %v2253_v60, %v726_v13  ;;  %v761_v58 = vsub.f32 %v2255_v61, %v726_v13 }
 0x1de   : > { %v2373_v43 = vpop.eup %1865  ;;  %1879 = vpow2.f32 %v814_v12  ;;  %854 = vadd.xlane.f32.xlu1 %v853_v14 }
 0x1df   : > { %v2376_v18 = vpop.eup %1867  ;;  %v816_v19 = vmul.f32 1.442695, %v760_v57  ;;  %v818_v20 = vmul.f32 1.442695, %v761_v58 }
 0x1e0   : > { %v729_v21 = vpop.xlane.xlu1 %728  ;;  %v856_v45 = vadd.f32 %v2376_v18, %v2373_v43 }
 0x1e1   : > { %1881 = vpow2.f32 %v816_v19  ;;  %v762_v60 = vsub.f32 %v2259_v63, %v729_v21  ;;  %v763_v61 = vsub.f32 %v2261_v0, %v729_v21 }
 0x1e2   : > { %v2382_v46 = vpop.eup %1869  ;;  %1883 = vpow2.f32 %v818_v20  ;;  %857 = vadd.xlane.f32.xlu0 %v856_v45 }
 0x1e3   : > { %v2384_v23 = vpop.eup %1871  ;;  %v820_v29 = vmul.f32 1.442695, %v762_v60  ;;  %v822_v24 = vmul.f32 1.442695, %v763_v61 }
 0x1e4   : > { %v732_v25 = vpop.xlane.xlu0 %731  ;;  %v859_v32 = vadd.f32 %v2384_v23, %v2382_v46 }
 0x1e5   : > { %1885 = vpow2.f32 %v820_v29  ;;  %v764_v48 = vsub.f32 %v2265_v2, %v732_v25  ;;  %v765_v49 = vsub.f32 %v2267_v3, %v732_v25 }
 0x1e6   : > { %v2390_v63 = vpop.eup %1873  ;;  %1887 = vpow2.f32 %v822_v24  ;;  %860 = vadd.xlane.f32.xlu1 %v859_v32 }
 0x1e7   : > { %v2392_v0 = vpop.eup %1875  ;;  %v824_v35 = vmul.f32 1.442695, %v764_v48  ;;  %v826_v28 = vmul.f32 1.442695, %v765_v49 }
 0x1e8   : > { %v735_v41 = vpop.xlane.xlu1 %734  ;;  %v862_v44 = vadd.f32 %v2392_v0, %v2390_v63 }
 0x1e9   : > { %1889 = vpow2.f32 %v824_v35  ;;  %v766_v30 = vsub.f32 %v2271_v5, %v735_v41  ;;  %v767_v50 = vsub.f32 %v2273_v6, %v735_v41 }
 0x1ea   : > { %v2398_v2 = vpop.eup %1877  ;;  %1891 = vpow2.f32 %v826_v28  ;;  %863 = vadd.xlane.f32.xlu0 %v862_v44 }
 0x1eb   : > { %v2400_v3 = vpop.eup %1879  ;;  %v828_v51 = vmul.f32 1.442695, %v766_v30  ;;  %v830_v52 = vmul.f32 1.442695, %v767_v50 }
 0x1ec   : > { %v865_v53 = vadd.f32 %v2400_v3, %v2398_v2 }
 0x1ed   : > { %1893 = vpow2.f32 %v828_v51 }
 0x1ee   : > { %v2404_v33 = vpop.eup %1881  ;;  %1895 = vpow2.f32 %v830_v52  ;;  %866 = vadd.xlane.f32.xlu1 %v865_v53 }
 0x1ef   : > { %v2406_v59 = vpop.eup %1883 }
 0x1f0   : > { %v868_v5 = vadd.f32 %v2406_v59, %v2404_v33 }
 0x1f2   : > { %v2410_v6 = vpop.eup %1885  ;;  %869 = vadd.xlane.f32.xlu0 %v868_v5 }
 0x1f3   : > { %v2412_v37 = vpop.eup %1887 }
 0x1f4   : > { %v871_v1 = vadd.f32 %v2412_v37, %v2410_v6 }
 0x1f6   : > { %v2416_v4 = vpop.eup %1889  ;;  %872 = vadd.xlane.f32.xlu1 %v871_v1 }
 0x1f7   : > { %v2418_v54 = vpop.eup %1891 }
 0x1f8   : > { %v874_v55 = vadd.f32 %v2418_v54, %v2416_v4 }
 0x1fa   : > { %v2422_v7 = vpop.eup %1893  ;;  %875 = vadd.xlane.f32.xlu0 %v874_v55 }
 0x1fb   : > { %v2424_v39 = vpop.eup %1895 }
 0x1fc   : > { %v877_v11 = vadd.f32 %v2424_v39, %v2422_v7 }
 0x1fe   : > { %878 = vadd.xlane.f32.xlu1 %v877_v11 }
 0x24b   : > { %v834_v12 = vpop.xlane.xlu0 %833 }
 0x24c   : > { %1897 = vrcp.f32 %v834_v12 }
 0x24f   : > { %v837_v13 = vpop.xlane.xlu1 %836 }
 0x250   : > { %1899 = vrcp.f32 %v837_v13 }
 0x253   : > { %v840_v14 = vpop.xlane.xlu0 %839 }
 0x254   : > { %1901 = vrcp.f32 %v840_v14 }
 0x257   : > { %v843_v42 = vpop.xlane.xlu1 %842 }
 0x258   : > { %1903 = vrcp.f32 %v843_v42 }
 0x259   : > { %v1898_v57 = vpop.eup %1897 }
 0x25a   : > { %v896_v58 = vmul.f32 %v1898_v57, %v2299_v47  ;;  %v897_v17 = vmul.f32 %v1898_v57, %v2301_v31 }
 0x25b   : > { %v846_v19 = vpop.xlane.xlu0 %845 }
 0x25c   : > { %1905 = vrcp.f32 %v846_v19  ;;  %v1607_v20 = vpack.c.bf16 %v897_v17, %v896_v58 }
 0x25d   : > { %v1900_v21 = vpop.eup %1899 }
 0x25e   : > { %v898_v45 = vmul.f32 %v1900_v21, %v2307_v62  ;;  %v899_v60 = vmul.f32 %v1900_v21, %v2309_v36  ;;  %1024 = vst [vmem:[%s2435_s22] sm:$0xff] %v1607_v20 }
 0x25f   : > { %v849_v61 = vpop.xlane.xlu1 %848 }
 0x260   : > { %1907 = vrcp.f32 %v849_v61  ;;  %v929_v29 = vpack.c.bf16 %v899_v60, %v897_v17  ;;  %v1608_v47 = vpack.c.bf16 %v899_v60, %v898_v45  ;;  %v928_v24 = vpack.c.bf16 %v898_v45, %v896_v58 }
 0x261   : > { %v1902_v31 = vpop.eup %1901 }
 0x262   : > { %1025 = vst [vmem:[%s2435_s22 + $0x8] sm:$0xff] %v1608_v47  ;;  %1200 = vmatprep.mubr.bf16.mxu1 %v929_v29  ;;  %v901_v25 = vmul.f32 %v1902_v31, %v2317_v40  ;;  %v900_v62 = vmul.f32 %v1902_v31, %v2315_v9 }
 0x263   : > { %v852_v36 = vpop.xlane.xlu0 %851  ;;  %1201 = vmatmul.mubr.bf16.vlgmr.msra.gmra.mxu1 %v928_v24 }
 0x264   : > { %1909 = vrcp.f32 %v852_v36  ;;  %v1609_v32 = vpack.c.bf16 %v901_v25, %v900_v62 }
 0x265   : > { %v1904_v48 = vpop.eup %1903 }
 0x266   : > { %v903_v49 = vmul.f32 %v1904_v48, %v2326_v16  ;;  %v902_v35 = vmul.f32 %v1904_v48, %v2323_v15  ;;  %1026 = vst [vmem:[%s2435_s22 + $0x10] sm:$0xff] %v1609_v32 }
 0x267   : > { %v855_v28 = vpop.xlane.xlu1 %854 }
 0x268   : > { %1911 = vrcp.f32 %v855_v28  ;;  %v931_v41 = vpack.c.bf16 %v903_v49, %v901_v25  ;;  %v930_v44 = vpack.c.bf16 %v902_v35, %v900_v62  ;;  %v1610_v30 = vpack.c.bf16 %v903_v49, %v902_v35 }
 0x269   : > { %v1906_v40 = vpop.eup %1905 }
 0x26a   : > { %1208 = vmatprep.mubr.bf16.mxu1 %v931_v41  ;;  %1027 = vst [vmem:[%s2435_s22 + $0x18] sm:$0xff] %v1610_v30  ;;  %v905_v9 = vmul.f32 %v1906_v40, %v2336_v26  ;;  %v904_v50 = vmul.f32 %v1906_v40, %v2333_v22 }
 0x26b   : > { %v858_v51 = vpop.xlane.xlu0 %857  ;;  %1209 = vmatmul.mubr.bf16.gmra.mxu1 %v930_v44 }
 0x26c   : > { %1913 = vrcp.f32 %v858_v51  ;;  %v1611_v16 = vpack.c.bf16 %v905_v9, %v904_v50 }
 0x26d   : > { %v1908_v15 = vpop.eup %1907 }
 0x26e   : > { %v907_v52 = vmul.f32 %v1908_v15, %v2346_v38  ;;  %v906_v53 = vmul.f32 %v1908_v15, %v2343_v27  ;;  %1028 = vst [vmem:[%s2435_s22 + $0x20] sm:$0xff] %v1611_v16 }
 0x26f   : > { %v861_v5 = vpop.xlane.xlu1 %860 }
 0x270   : > { %1915 = vrcp.f32 %v861_v5  ;;  %v933_v1 = vpack.c.bf16 %v907_v52, %v905_v9  ;;  %v932_v55 = vpack.c.bf16 %v906_v53, %v904_v50  ;;  %v1612_v11 = vpack.c.bf16 %v907_v52, %v906_v53 }
 0x271   : > { %v1910_v26 = vpop.eup %1909 }
 0x272   : > { %1216 = vmatprep.mubr.bf16.mxu1 %v933_v1  ;;  %1029 = vst [vmem:[%s2435_s22 + $0x28] sm:$0xff] %v1612_v11  ;;  %v909_v22 = vmul.f32 %v1910_v26, %v2356_v34  ;;  %v908_v12 = vmul.f32 %v1910_v26, %v2353_v56 }
 0x273   : > { %v864_v13 = vpop.xlane.xlu0 %863  ;;  %1217 = vmatmul.mubr.bf16.gmra.mxu1 %v932_v55 }
 0x274   : > { %1917 = vrcp.f32 %v864_v13  ;;  %v1613_v38 = vpack.c.bf16 %v909_v22, %v908_v12 }
 0x275   : > { %v1912_v27 = vpop.eup %1911 }
 0x276   : > { %v911_v14 = vmul.f32 %v1912_v27, %v2366_v10  ;;  %v910_v42 = vmul.f32 %v1912_v27, %v2363_v8  ;;  %1030 = vst [vmem:[%s2435_s22 + $0x30] sm:$0xff] %v1613_v38 }
 0x277   : > { %v867_v57 = vpop.xlane.xlu1 %866 }
 0x278   : > { %1919 = vrcp.f32 %v867_v57  ;;  %v935_v58 = vpack.c.bf16 %v911_v14, %v909_v22  ;;  %v934_v17 = vpack.c.bf16 %v910_v42, %v908_v12  ;;  %v1614_v19 = vpack.c.bf16 %v911_v14, %v910_v42 }
 0x279   : > { %v1914_v34 = vpop.eup %1913 }
 0x27a   : > { %1224 = vmatprep.mubr.bf16.mxu1 %v935_v58  ;;  %1031 = vst [vmem:[%s2435_s22 + $0x38] sm:$0xff] %v1614_v19  ;;  %v913_v56 = vmul.f32 %v1914_v34, %v2376_v18  ;;  %v912_v20 = vmul.f32 %v1914_v34, %v2373_v43 }
 0x27b   : > { %v870_v21 = vpop.xlane.xlu0 %869  ;;  %1225 = vmatmul.mubr.bf16.gmra.mxu1 %v934_v17 }
 0x27c   : > { %1921 = vrcp.f32 %v870_v21  ;;  %v1615_v10 = vpack.c.bf16 %v913_v56, %v912_v20 }
 0x27d   : > { %v1916_v8 = vpop.eup %1915 }
 0x27e   : > { %v915_v45 = vmul.f32 %v1916_v8, %v2384_v23  ;;  %v914_v60 = vmul.f32 %v1916_v8, %v2382_v46  ;;  %1032 = vst [vmem:[%s2435_s22 + $0x40] sm:$0xff] %v1615_v10 }
 0x27f   : > { %v873_v61 = vpop.xlane.xlu1 %872 }
 0x280   : > { %1923 = vrcp.f32 %v873_v61  ;;  %v937_v29 = vpack.c.bf16 %v915_v45, %v913_v56  ;;  %v936_v47 = vpack.c.bf16 %v914_v60, %v912_v20  ;;  %v1616_v24 = vpack.c.bf16 %v915_v45, %v914_v60 }
 0x281   : > { %v1918_v18 = vpop.eup %1917 }
 0x282   : > { %1232 = vmatprep.mubr.bf16.mxu1 %v937_v29  ;;  %1033 = vst [vmem:[%s2435_s22 + $0x48] sm:$0xff] %v1616_v24  ;;  %v917_v43 = vmul.f32 %v1918_v18, %v2392_v0  ;;  %v916_v31 = vmul.f32 %v1918_v18, %v2390_v63 }
 0x283   : > { %v876_v25 = vpop.xlane.xlu0 %875  ;;  %1233 = vmatmul.mubr.bf16.gmra.mxu1 %v936_v47 }
 0x284   : > { %1925 = vrcp.f32 %v876_v25  ;;  %v1617_v23 = vpack.c.bf16 %v917_v43, %v916_v31 }
 0x285   : > { %v1920_v46 = vpop.eup %1919 }
 0x286   : > { %v919_v62 = vmul.f32 %v1920_v46, %v2400_v3  ;;  %v918_v36 = vmul.f32 %v1920_v46, %v2398_v2  ;;  %1034 = vst [vmem:[%s2435_s22 + $0x50] sm:$0xff] %v1617_v23 }
 0x287   : > { %v879_v32 = vpop.xlane.xlu1 %878 }
 0x288   : > { %1927 = vrcp.f32 %v879_v32  ;;  %v939_v48 = vpack.c.bf16 %v919_v62, %v917_v43  ;;  %v938_v49 = vpack.c.bf16 %v918_v36, %v916_v31  ;;  %v1618_v35 = vpack.c.bf16 %v919_v62, %v918_v36 }
 0x289   : > { %v1922_v0 = vpop.eup %1921 }
 0x28a   : > { %1240 = vmatprep.mubr.bf16.mxu1 %v939_v48  ;;  %1035 = vst [vmem:[%s2435_s22 + $0x58] sm:$0xff] %v1618_v35  ;;  %v921_v63 = vmul.f32 %v1922_v0, %v2406_v59  ;;  %v920_v28 = vmul.f32 %v1922_v0, %v2404_v33 }
 0x28b   : > { %1241 = vmatmul.mubr.bf16.gmra.mxu1 %v938_v49 }
 0x28c   : > { %v1619_v41 = vpack.c.bf16 %v921_v63, %v920_v28 }
 0x28d   : > { %v1924_v3 = vpop.eup %1923 }
 0x28e   : > { %v923_v2 = vmul.f32 %v1924_v3, %v2412_v37  ;;  %v922_v44 = vmul.f32 %v1924_v3, %v2410_v6  ;;  %1036 = vst [vmem:[%s2435_s22 + $0x60] sm:$0xff] %v1619_v41 }
 0x290   : > { %v941_v30 = vpack.c.bf16 %v923_v2, %v921_v63  ;;  %v940_v40 = vpack.c.bf16 %v922_v44, %v920_v28  ;;  %v1620_v9 = vpack.c.bf16 %v923_v2, %v922_v44 }
 0x291   : > { %v1926_v50 = vpop.eup %1925 }
 0x292   : > { %1248 = vmatprep.mubr.bf16.mxu1 %v941_v30  ;;  %1037 = vst [vmem:[%s2435_s22 + $0x68] sm:$0xff] %v1620_v9  ;;  %v925_v33 = vmul.f32 %v1926_v50, %v2418_v54  ;;  %v924_v59 = vmul.f32 %v1926_v50, %v2416_v4 }
 0x293   : > { %1249 = vmatmul.mubr.bf16.gmra.mxu1 %v940_v40 }
 0x294   : > { %v1621_v37 = vpack.c.bf16 %v925_v33, %v924_v59 }
 0x295   : > { %v1928_v51 = vpop.eup %1927 }
 0x296   : > { %v927_v6 = vmul.f32 %v1928_v51, %v2424_v39  ;;  %v926_v16 = vmul.f32 %v1928_v51, %v2422_v7  ;;  %1038 = vst [vmem:[%s2435_s22 + $0x70] sm:$0xff] %v1621_v37 }
 0x298   : > { %v943_v15 = vpack.c.bf16 %v927_v6, %v925_v33  ;;  %v942_v52 = vpack.c.bf16 %v926_v16, %v924_v59  ;;  %v1622_v53 = vpack.c.bf16 %v927_v6, %v926_v16 }
 0x29a   : > { %1256 = vmatprep.mubr.bf16.mxu1 %v943_v15  ;;  %1039 = vst [vmem:[%s2435_s22 + $0x78] sm:$0xff] %v1622_v53  ;;  %s1935_s22 = scalar_lea.vmem %s1934_s27, 4096 }
 0x29b   : > { %1257 = vmatmul.mubr.bf16.gmra.mxu1 %v942_v52  ;;  %p1937_p5 = scmp.lt.s32.totalorder %s1935_s22, %s1929_s0 }
 0x29d   : > { %p1938_p6 = por %p1937_p5, %p1936_p4 }
 0x29f   : > { %p1939_p7 = pnand %p1938_p6, %p1932_p2 }
 0x2a1   : > { %1942 = shalt.err (!%p1939_p7)
}
 0x2a2   : > { %s1943_s18 = scalar_lea.hbm %s2487_s21, 2048  ;;  %s1947_s13 = scalar_lea.hbm %s2627_s6, 8192 }
 0x2a3   : > { %p1944_p9 = scmp.ne.s32.totalorder %s2487_s21, %s1943_s18  ;;  %p1948_p12 = scmp.lt.s32.totalorder %s2487_s21, %s2627_s6 }
 0x2a4   : > { %p1949_p13 = scmp.lt.s32.totalorder %s1947_s13, %s1943_s18 }
 0x2a5   : > { %p1945_p10 = pnand %p1944_p9, %p2115_p3 }
 0x2a6   : > { %p1950_p0 = por %p1949_p13, %p1948_p12 }
 0x2a7   : > { %p1946_p11 = pneg %p1945_p10 }
 0x2a9   : > { %p1951_p1 = pnand %p1950_p0, %p1946_p11 }
 0x2ab   : > { %1954 = shalt.err (!%p1951_p1)
}
 0x2ac   : > { %s2024_s0 = smov 128   ;;  %s2025_s20 = smov 8   ;;  %vm1315_vm0 = vcmask 130048  }
 0x2ad   : > { %1720 = dma.vmem_to_hbm [thread:$0]  (%p2115_p3), %s2489_s15, 2048, %s2487_s21, %s2493_s19, %s2024_s0, %s2024_s0, %s2025_s20  }
 0x2ae   : > { %s1265_s26 = sld [smem:[#allocation2]]  ;;  %s1538_s27 = sshll.u32 %s2153_s7, 3 }
 0x2af   : > { %s2520_s10 = scalar_lea.vmem %s2624_s3, %s1538_s27  ;;  %s2529_s7 = scalar_lea.vmem %s2626_s5, %s1538_s27 }
 0x2b0   : > { %v1283_v5 = vld [vmem:[%s2520_s10] sm:$0xff]  ;;  %v1284_v12 = vld [vmem:[%s2520_s10 + $0x8] sm:$0xff]  ;;  %v1285_v57 = vld [vmem:[%s2520_s10 + $0x10] sm:$0xff] }
 0x2b1   : > { %v1286_v20 = vld [vmem:[%s2520_s10 + $0x18] sm:$0xff]  ;;  %v1287_v61 = vld [vmem:[%s2520_s10 + $0x20] sm:$0xff]  ;;  %v1288_v31 = vld [vmem:[%s2520_s10 + $0x28] sm:$0xff] }
 0x2b2   : > { %v1289_v32 = vld [vmem:[%s2520_s10 + $0x30] sm:$0xff]  ;;  %v1290_v28 = vld [vmem:[%s2520_s10 + $0x38] sm:$0xff]  ;;  %v1291_v40 = vld [vmem:[%s2520_s10 + $0x40] sm:$0xff] }
 0x2b3   : > { %v1292_v51 = vld [vmem:[%s2520_s10 + $0x48] sm:$0xff] }
 0x2b4   : > { %v2522_v7 = vstv %s1265_s26 }
 0x323   : > { %v1672_v4 = vpop.f32.mrf.mxu1 }
 0x325   : > { %v1673_v54 = vpop.f32.mrf.mxu1 }
 0x326   : > { %v1674_v39 = vadd.f32 %v1673_v54, %v1672_v4  ;;  %v1293_v4 = vld [vmem:[%s2520_s10 + $0x50] sm:$0xff] }
 0x327   : > { %v1675_v1 = vpop.f32.mrf.mxu1 }
 0x328   : > { %v1267_v55 = vmul.f32 %v1674_v39, %v2522_v7 }
 0x329   : > { %v1676_v11 = vpop.f32.mrf.mxu1 }
 0x32a   : > { %v1299_v26 = vadd.f32 %v1283_v5, %v1267_v55  ;;  %v1677_v22 = vadd.f32 %v1676_v11, %v1675_v1  ;;  %v1294_v11 = vld [vmem:[%s2520_s10 + $0x58] sm:$0xff] }
 0x32b   : > { %v1678_v13 = vpop.f32.mrf.mxu1 }
 0x32c   : > { %1316 = vst.msk [vmem:[%s2529_s7] sm:$0xff] %vm1315_vm0, %v1299_v26  ;;  %v1268_v38 = vmul.f32 %v1677_v22, %v2522_v7 }
 0x32d   : > { %v1679_v27 = vpop.f32.mrf.mxu1 }
 0x32e   : > { %v1300_v14 = vadd.f32 %v1284_v12, %v1268_v38  ;;  %v1680_v42 = vadd.f32 %v1679_v27, %v1678_v13  ;;  %v1295_v27 = vld [vmem:[%s2520_s10 + $0x60] sm:$0xff] }
 0x32f   : > { %v1681_v58 = vpop.f32.mrf.mxu1 }
 0x330   : > { %1317 = vst.msk [vmem:[%s2529_s7 + $0x8] sm:$0xff] %vm1315_vm0, %v1300_v14  ;;  %v1269_v17 = vmul.f32 %v1680_v42, %v2522_v7 }
 0x331   : > { %v1682_v19 = vpop.f32.mrf.mxu1 }
 0x332   : > { %v1301_v34 = vadd.f32 %v1285_v57, %v1269_v17  ;;  %v1683_v56 = vadd.f32 %v1682_v19, %v1681_v58  ;;  %v1296_v19 = vld [vmem:[%s2520_s10 + $0x68] sm:$0xff] }
 0x333   : > { %v1684_v21 = vpop.f32.mrf.mxu1 }
 0x334   : > { %1318 = vst.msk [vmem:[%s2529_s7 + $0x10] sm:$0xff] %vm1315_vm0, %v1301_v34  ;;  %v1270_v10 = vmul.f32 %v1683_v56, %v2522_v7 }
 0x335   : > { %v1685_v8 = vpop.f32.mrf.mxu1 }
 0x336   : > { %v1302_v45 = vadd.f32 %v1286_v20, %v1270_v10  ;;  %v1686_v60 = vadd.f32 %v1685_v8, %v1684_v21  ;;  %v1297_v8 = vld [vmem:[%s2520_s10 + $0x70] sm:$0xff] }
 0x337   : > { %v1687_v29 = vpop.f32.mrf.mxu1 }
 0x338   : > { %1319 = vst.msk [vmem:[%s2529_s7 + $0x18] sm:$0xff] %vm1315_vm0, %v1302_v45  ;;  %v1271_v47 = vmul.f32 %v1686_v60, %v2522_v7 }
 0x339   : > { %v1688_v24 = vpop.f32.mrf.mxu1 }
 0x33a   : > { %v1303_v18 = vadd.f32 %v1287_v61, %v1271_v47  ;;  %v1689_v43 = vadd.f32 %v1688_v24, %v1687_v29  ;;  %v1298_v24 = vld [vmem:[%s2520_s10 + $0x78] sm:$0xff] }
 0x33b   : > { %v1690_v25 = vpop.f32.mrf.mxu1 }
 0x33c   : > { %1320 = vst.msk [vmem:[%s2529_s7 + $0x20] sm:$0xff] %vm1315_vm0, %v1303_v18  ;;  %v1272_v23 = vmul.f32 %v1689_v43, %v2522_v7 }
 0x33d   : > { %v1691_v46 = vpop.f32.mrf.mxu1 }
 0x33e   : > { %v1304_v62 = vadd.f32 %v1288_v31, %v1272_v23  ;;  %v1692_v36 = vadd.f32 %v1691_v46, %v1690_v25 }
 0x33f   : > { %v1693_v48 = vpop.f32.mrf.mxu1 }
 0x340   : > { %1321 = vst.msk [vmem:[%s2529_s7 + $0x28] sm:$0xff] %vm1315_vm0, %v1304_v62  ;;  %v1273_v49 = vmul.f32 %v1692_v36, %v2522_v7 }
 0x341   : > { %v1694_v35 = vpop.f32.mrf.mxu1 }
 0x342   : > { %v1305_v0 = vadd.f32 %v1289_v32, %v1273_v49  ;;  %v1695_v63 = vadd.f32 %v1694_v35, %v1693_v48 }
 0x343   : > { %v1696_v41 = vpop.f32.mrf.mxu1 }
 0x344   : > { %1322 = vst.msk [vmem:[%s2529_s7 + $0x30] sm:$0xff] %vm1315_vm0, %v1305_v0  ;;  %v1274_v3 = vmul.f32 %v1695_v63, %v2522_v7 }
 0x345   : > { %v1697_v2 = vpop.f32.mrf.mxu1 }
 0x346   : > { %v1306_v44 = vadd.f32 %v1290_v28, %v1274_v3  ;;  %v1698_v30 = vadd.f32 %v1697_v2, %v1696_v41 }
 0x347   : > { %v1699_v9 = vpop.f32.mrf.mxu1 }
 0x348   : > { %1323 = vst.msk [vmem:[%s2529_s7 + $0x38] sm:$0xff] %vm1315_vm0, %v1306_v44  ;;  %v1275_v50 = vmul.f32 %v1698_v30, %v2522_v7 }
 0x349   : > { %v1700_v33 = vpop.f32.mrf.mxu1 }
 0x34a   : > { %v1307_v59 = vadd.f32 %v1291_v40, %v1275_v50  ;;  %v1701_v37 = vadd.f32 %v1700_v33, %v1699_v9 }
 0x34b   : > { %v1702_v6 = vpop.f32.mrf.mxu1 }
 0x34c   : > { %1324 = vst.msk [vmem:[%s2529_s7 + $0x40] sm:$0xff] %vm1315_vm0, %v1307_v59  ;;  %v1276_v16 = vmul.f32 %v1701_v37, %v2522_v7 }
 0x34d   : > { %v1703_v15 = vpop.f32.mrf.mxu1 }
 0x34e   : > { %v1308_v52 = vadd.f32 %v1292_v51, %v1276_v16  ;;  %v1704_v53 = vadd.f32 %v1703_v15, %v1702_v6 }
 0x34f   : > { %v1705_v54 = vpop.f32.mrf.mxu1 }
 0x350   : > { %1325 = vst.msk [vmem:[%s2529_s7 + $0x48] sm:$0xff] %vm1315_vm0, %v1308_v52  ;;  %v1277_v39 = vmul.f32 %v1704_v53, %v2522_v7 }
 0x351   : > { %v1706_v5 = vpop.f32.mrf.mxu1 }
 0x352   : > { %v1309_v1 = vadd.f32 %v1293_v4, %v1277_v39  ;;  %v1707_v55 = vadd.f32 %v1706_v5, %v1705_v54 }
 0x353   : > { %v1708_v26 = vpop.f32.mrf.mxu1 }
 0x354   : > { %1326 = vst.msk [vmem:[%s2529_s7 + $0x50] sm:$0xff] %vm1315_vm0, %v1309_v1  ;;  %v1278_v22 = vmul.f32 %v1707_v55, %v2522_v7 }
 0x355   : > { %v1709_v12 = vpop.f32.mrf.mxu1 }
 0x356   : > { %v1310_v13 = vadd.f32 %v1294_v11, %v1278_v22  ;;  %v1710_v38 = vadd.f32 %v1709_v12, %v1708_v26 }
 0x357   : > { %v1711_v14 = vpop.f32.mrf.mxu1 }
 0x358   : > { %1327 = vst.msk [vmem:[%s2529_s7 + $0x58] sm:$0xff] %vm1315_vm0, %v1310_v13  ;;  %v1279_v42 = vmul.f32 %v1710_v38, %v2522_v7 }
 0x359   : > { %v1712_v57 = vpop.f32.mrf.mxu1 }
 0x35a   : > { %v1311_v58 = vadd.f32 %v1295_v27, %v1279_v42  ;;  %v1713_v17 = vadd.f32 %v1712_v57, %v1711_v14 }
 0x35b   : > { %v1714_v34 = vpop.f32.mrf.mxu1 }
 0x35c   : > { %1328 = vst.msk [vmem:[%s2529_s7 + $0x60] sm:$0xff] %vm1315_vm0, %v1311_v58  ;;  %v1280_v56 = vmul.f32 %v1713_v17, %v2522_v7 }
 0x35d   : > { %v1715_v20 = vpop.f32.mrf.mxu1 }
 0x35e   : > { %v1312_v21 = vadd.f32 %v1296_v19, %v1280_v56  ;;  %v1716_v10 = vadd.f32 %v1715_v20, %v1714_v34 }
 0x35f   : > { %v1717_v45 = vpop.f32.mrf.mxu1 }
 0x360   : > { %1329 = vst.msk [vmem:[%s2529_s7 + $0x68] sm:$0xff] %vm1315_vm0, %v1312_v21  ;;  %v1281_v60 = vmul.f32 %v1716_v10, %v2522_v7 }
 0x361   : > { %v1718_v61 = vpop.f32.mrf.mxu1 }
 0x362   : > { %v1313_v29 = vadd.f32 %v1297_v8, %v1281_v60  ;;  %v1719_v47 = vadd.f32 %v1718_v61, %v1717_v45 }
 0x364   : > { %1330 = vst.msk [vmem:[%s2529_s7 + $0x70] sm:$0xff] %vm1315_vm0, %v1313_v29  ;;  %v1282_v18 = vmul.f32 %v1719_v47, %v2522_v7 }
 0x366   : > { %v1314_v43 = vadd.f32 %v1298_v24, %v1282_v18 }
 0x368   : > { %1331 = vst.msk [vmem:[%s2529_s7 + $0x78] sm:$0xff] %vm1315_vm0, %v1314_v43 }
 0x369 PF: > { %p1726_p3 = scmp.ge.s32.totalorder %s2021_s30, 2  ;;  %s1389_s21 = sand.u32 1, %s1993_s23  }
 0x36a   : > { %s1390_s19 = scalar_lea.sflag [#allocation4], %s1389_s21 }
 0x36b   : > { %p1723_p2 = pnand %p1726_p3, %p2124_p8 }
 0x36d   : > { %p1724_p4 = pneg %p1723_p2 }
 0x36f   : > { %1988 = dma.done.wait (%p1724_p4), %s1390_s19, 2048  }
 0x370   : > { %1990 = vsyncadd (%p1724_p4), %s1390_s19, 4294965248  ;;  %s21_s30 = sadd.s32 1, %s2021_s30   ;;  %s2632_s23 = smov %s1997_s24 }
 0x371   : > { %p18_p5 = scmp.ge.s32.totalorder %s21_s30, 6   ;;  %s2633_s24 = smov %s2001_s25 }
 0x372   : > { %s2634_s25 = smov %s2133_s16  ;;  %s2635_s26 = smov %s2013_s28 }
 0x373   : > { %s2636_s27 = smov %s2017_s29  ;;  %s2637_s28 = smov %s2640_s8 }
 0x374   : > { %s2638_s29 = smov %s2644_s9  ;;  %20 = sbr.rel (!%p18_p5) target bundleno = 8 (0x8), region = 96 }
 0x379   :  { %1395 = vsyncpa [#allocation4], 1 }
 0x37a   :  { %1397 = vsyncpa [#allocation4 + $0x1], 1 }

</bundles_post_ra>
